<compile_context>
chip_gen: v7x
topology: tpu7x:2x2x1
jax: 0.10.0
libtpu: 0.0.40
codegen_flags: <defaults>
</compile_context>

<pallas_src>
import functools

import jax
import jax.numpy as jnp
from jax import lax
from jax.experimental import pallas as pl
from jax.experimental.pallas import tpu as pltpu

LN_EPS = 1e-5


def _patch_merge_kernel(x_ref, w_ref, cb_ref, o_ref, *, lhs_dtype):
    # x_ref : (th, 2, W2, 2C)  merged input tile
    #           parity 0 = h-even rows, channels [x0 | x2]
    #           parity 1 = h-odd  rows, channels [x1 | x3]
    # w_ref : (2, 2C, 2C)      folded weight, one (2C, 2C) chunk per parity
    # cb_ref: (2, 1, 2C)       row 0 = column sums of folded weight, row 1 = folded bias
    # o_ref : (th * W2, 2C)
    th, _, w2, c2 = x_ref.shape
    rows = th * w2
    inv_feat = 1.0 / (2.0 * c2)          # 1 / (4C)

    # Raw storage-dtype tiles.  The (th, W2, 2C) -> (rows, 2C) collapse is a
    # free view when W2 is sublane-aligned, otherwise one in-VMEM relayout.
    xe = x_ref[:, 0].reshape(rows, c2)   # h-even rows: [x0 | x2]
    xo = x_ref[:, 1].reshape(rows, c2)   # h-odd  rows: [x1 | x3]

    # LayerNorm statistics over the full 4C features (f32 only here).
    xe_f = xe.astype(jnp.float32)
    xo_f = xo.astype(jnp.float32)
    s1 = jnp.sum(xe_f, axis=-1, keepdims=True) + jnp.sum(xo_f, axis=-1, keepdims=True)
    s2 = (jnp.sum(xe_f * xe_f, axis=-1, keepdims=True)
          + jnp.sum(xo_f * xo_f, axis=-1, keepdims=True))
    mean = s1 * inv_feat
    var = jnp.maximum(s2 * inv_feat - mean * mean, 0.0)
    inv_std = lax.rsqrt(var + LN_EPS)

    # Raw activations go straight to the MXU (no f32 round trip); f32 accumulate.
    if lhs_dtype is not None:            # only for the f32-input / big-C path
        xe = xe.astype(lhs_dtype)
        xo = xo.astype(lhs_dtype)
    acc = jnp.dot(xe, w_ref[0], preferred_element_type=jnp.float32)
    acc = acc + jnp.dot(xo, w_ref[1], preferred_element_type=jnp.float32)

    # Folded LayerNorm correction applied on the small (rows, 2C) output tile.
    out = (acc - mean * cb_ref[0]) * inv_std + cb_ref[1]
    o_ref[...] = out.astype(o_ref.dtype)


def _pick_row_tile(bh, w2, rows_cap):
    """Merged h-rows per grid step.

    The output block's first dim is th*w2, which must be a multiple of 8
    unless it spans the full extent.  The grid is cdiv(bh, th) with a masked
    partial tail (no divisor constraint), and th is capped at ceil(bh/2) so
    the 1-D parallel grid has >= 2 steps to shard across v7x's two cores.
    """
    cap = max(1, rows_cap // max(w2, 1))
    cap = min(cap, bh)
    if bh >= 2:
        cap = max(1, min(cap, pl.cdiv(bh, 2)))
    for th in range(cap, 0, -1):
        if (th * w2) % 8 == 0:
            return th
    return bh   # tiny input: single full-extent block (always layout-legal)


def patch_merging(x, w_red, ln_gamma, ln_beta, input_resolution, *, rows_cap=4096):
    """PatchMerging forward.

    x:        (B, H*W, C)
    w_red:    (4C, 2C)  -- transpose of torch nn.Linear(4C, 2C, bias=False).weight
    ln_gamma: (4C,)     -- LayerNorm weight
    ln_beta:  (4C,)     -- LayerNorm bias
    returns:  (B, H/2 * W/2, 2C), same dtype as x
    """
    H, W = input_resolution
    B, L, C = x.shape
    assert L == H * W, "input feature has wrong size"
    assert H % 2 == 0 and W % 2 == 0, f"x size ({H}*{W}) are not even."
    H2, W2 = H // 2, W // 2
    C2, C4 = 2 * C, 4 * C
    BH = B * H2

    if x.dtype not in (jnp.bfloat16, jnp.float32):
        x = x.astype(jnp.float32)
    # bf16 inputs hit the bf16 MXU fast path directly.  f32 inputs stay exact
    # unless C is large enough that the f32 matmul would dominate on v5e's
    # MXU; then cast only the matmul operands to bf16 (stats/accum stay f32).
    use_bf16_mxu = (x.dtype == jnp.float32) and (C >= 256)
    w_dtype = jnp.bfloat16 if (x.dtype == jnp.bfloat16 or use_bf16_mxu) else jnp.float32
    lhs_dtype = jnp.bfloat16 if use_bf16_mxu else None

    # ---- fold the LayerNorm affine into the reduction weight (outside kernel) ---
    w_f = w_red.astype(jnp.float32)                               # (4C, 2C)
    w_fold = ln_gamma.astype(jnp.float32)[:, None] * w_f          # gamma-scaled rows
    bias = ln_beta.astype(jnp.float32)[None, :] @ w_f             # (1, 2C)
    # h-even rows carry [x0 | x2] channels, h-odd rows carry [x1 | x3]:
    wa = jnp.concatenate([w_fold[0:C], w_fold[2 * C:3 * C]], axis=0)   # (2C, 2C)
    wb = jnp.concatenate([w_fold[C:2 * C], w_fold[3 * C:4 * C]], axis=0)
    w_stack = jnp.stack([wa, wb], axis=0).astype(w_dtype)         # (2, 2C, 2C)
    # Column sums of the weight the MXU actually multiplies (rounded to
    # w_dtype) so the mean cancellation is consistent with the matmul.
    colsum = jnp.sum(w_stack.astype(jnp.float32), axis=(0, 1)).reshape(1, C2)
    cb = jnp.stack([colsum, bias], axis=0)                        # (2, 1, 2C) f32

    # ---- free reshape: (B, H*W, C) -> (B*H/2, 2, W/2, 2C) ----------------------
    x4 = x.reshape(BH, 2, W2, C2)

    # ---- tiling ----------------------------------------------------------------
    # Clip rows_cap by a rough per-step VMEM working-set budget (double-buffered
    # IO plus the in-kernel f32 temporaries), leaving headroom under 64 MiB/TC.
    bytes_in = 2 * C2 * x.dtype.itemsize
    bytes_out = C2 * x.dtype.itemsize
    bytes_f32 = (2 * C2 + 2 * C2) * 4          # xe_f/xo_f + acc/out temporaries
    per_row = 2 * bytes_in + 2 * bytes_out + bytes_f32
    rows_cap = max(256, min(rows_cap, (40 * 1024 * 1024) // per_row))

    th = _pick_row_tile(BH, W2, rows_cap)
    tile_rows = th * W2
    grid = (pl.cdiv(BH, th),)

    kernel = functools.partial(_patch_merge_kernel, lhs_dtype=lhs_dtype)

    out2d = pl.pallas_call(
        kernel,
        out_shape=jax.ShapeDtypeStruct((BH * W2, C2), x.dtype),
        grid_spec=pltpu.PrefetchScalarGridSpec(
            num_scalar_prefetch=0,
            grid=grid,
            in_specs=[
                # Single contiguous merged tile per step (both parities).
                pl.BlockSpec((th, 2, W2, C2), lambda i: (i, 0, 0, 0)),
                # Folded weights, resident across the grid.
                pl.BlockSpec((2, C2, C2), lambda i: (0, 0, 0)),
                # Column sums + folded bias, resident.
                pl.BlockSpec((2, 1, C2), lambda i: (0, 0, 0)),
            ],
            out_specs=pl.BlockSpec((tile_rows, C2), lambda i: (i, 0)),
        ),
        compiler_params=pltpu.CompilerParams(
            dimension_semantics=("parallel",),
            vmem_limit_bytes=48 * 1024 * 1024,
        ),
    )(x4, w_stack, cb)

    return out2d.reshape(B, H2 * W2, C2)


def _reference(x, w_red, ln_gamma, ln_beta, input_resolution):
    """Pure-JAX f32 reference mirroring the PyTorch forward."""
    H, W = input_resolution
    B, L, C = x.shape
    xr = x.astype(jnp.float32).reshape(B, H, W, C)
    x0 = xr[:, 0::2, 0::2, :]
    x1 = xr[:, 1::2, 0::2, :]
    x2 = xr[:, 0::2, 1::2, :]
    x3 = xr[:, 1::2, 1::2, :]
    xm = jnp.concatenate([x0, x1, x2, x3], axis=-1).reshape(B, -1, 4 * C)
    mean = jnp.mean(xm, axis=-1, keepdims=True)
    var = jnp.mean((xm - mean) ** 2, axis=-1, keepdims=True)
    xn = (xm - mean) / jnp.sqrt(var + LN_EPS)
    xn = xn * ln_gamma.astype(jnp.float32) + ln_beta.astype(jnp.float32)
    return jnp.einsum("blk,kn->bln", xn, w_red.astype(jnp.float32))


if __name__ == "__main__":
    # Small shapes consistent with the module: B=2, dim C=4, H=W=16.
    B, C, H, W = 2, 4, 16, 16
    key = jax.random.PRNGKey(0)
    kx, kw, kg, kb = jax.random.split(key, 4)

    x = jax.random.normal(kx, (B, H * W, C), dtype=jnp.float32)
    # nn.Linear(4C, 2C, bias=False) weight stored transposed as (4C, 2C).
    w_red = jax.random.normal(kw, (4 * C, 2 * C), dtype=jnp.float32) * 0.02
    # Non-trivial LayerNorm affine to exercise the weight folding.
    ln_gamma = 1.0 + 0.1 * jax.random.normal(kg, (4 * C,), dtype=jnp.float32)
    ln_beta = 0.05 * jax.random.normal(kb, (4 * C,), dtype=jnp.float32)

    fwd = jax.jit(patch_merging, static_argnames=("input_resolution",))

    # f32 path: matches the f32 reference tightly.
    out = jax.block_until_ready(fwd(x, w_red, ln_gamma, ln_beta,
                                    input_resolution=(H, W)))
    ref = _reference(x, w_red, ln_gamma, ln_beta, (H, W))
    assert out.shape == (B, (H // 2) * (W // 2), 2 * C)
    assert jnp.allclose(out, ref, atol=1e-4, rtol=1e-4)

    # bf16 path: raw bf16 activations + folded bf16 weights feed the MXU
    # (LN stats stay f32); relaxed tolerance vs the f32 reference.
    xb = x.astype(jnp.bfloat16)
    outb = jax.block_until_ready(fwd(xb, w_red, ln_gamma, ln_beta,
                                     input_resolution=(H, W)))
    refb = _reference(xb, w_red, ln_gamma, ln_beta, (H, W))
    assert outb.dtype == jnp.bfloat16
    assert jnp.allclose(outb.astype(jnp.float32), refb, atol=2e-2, rtol=2e-2)

    print("KERNEL_OK")
</pallas_src>

<mosaic_0001>
module attributes {stable_mosaic.version = 11 : i64} {
  func.func @_patch_merge_kernel(%arg0: i32, %arg1: memref<8x2x8x8xf32, #tpu.memory_space<vmem>>, %arg2: memref<2x8x8xf32, #tpu.memory_space<vmem>>, %arg3: memref<2x1x8xf32, #tpu.memory_space<vmem>>, %arg4: memref<64x8xf32, #tpu.memory_space<vmem>>) attributes {dimension_semantics = [#tpu.dimension_semantics<parallel>], iteration_bounds = array<i64: 2>, scalar_prefetch = 0 : i64, scratch_operands = 0 : i64, tpu.core_type = #tpu.core_type<tc>, window_params = [{transform_indices = @transform_0, window_bounds = array<i64: 8, 2, 8, 8>}, {pipeline_mode = #tpu.pipeline_mode<synchronous>, transform_indices = @transform_1, window_bounds = array<i64: 2, 8, 8>}, {pipeline_mode = #tpu.pipeline_mode<synchronous>, transform_indices = @transform_2, window_bounds = array<i64: 2, 1, 8>}, {transform_indices = @transform_3, window_bounds = array<i64: 64, 8>}]} {
    %c0 = arith.constant 0 : index
    %c0_0 = arith.constant 0 : index
    %c0_1 = arith.constant 0 : index
    %c0_2 = arith.constant 0 : index
    %0 = vector.load %arg1[%c0, %c0_0, %c0_1, %c0_2] : memref<8x2x8x8xf32, #tpu.memory_space<vmem>>, vector<8x1x8x8xf32>
    %1 = vector.shape_cast %0 : vector<8x1x8x8xf32> to vector<8x8x8xf32>
    %2 = vector.shape_cast %1 : vector<8x8x8xf32> to vector<64x8xf32>
    %c0_3 = arith.constant 0 : index
    %c1 = arith.constant 1 : index
    %c0_4 = arith.constant 0 : index
    %c0_5 = arith.constant 0 : index
    %3 = vector.load %arg1[%c0_3, %c1, %c0_4, %c0_5] : memref<8x2x8x8xf32, #tpu.memory_space<vmem>>, vector<8x1x8x8xf32>
    %4 = vector.shape_cast %3 : vector<8x1x8x8xf32> to vector<8x8x8xf32>
    %5 = vector.shape_cast %4 : vector<8x8x8xf32> to vector<64x8xf32>
    %cst = arith.constant dense<0.000000e+00> : vector<64xf32>
    %6 = vector.multi_reduction <add>, %2, %cst [1] : vector<64x8xf32> to vector<64xf32>
    %7 = vector.shape_cast %6 : vector<64xf32> to vector<64x1xf32>
    %cst_6 = arith.constant dense<0.000000e+00> : vector<64xf32>
    %8 = vector.multi_reduction <add>, %5, %cst_6 [1] : vector<64x8xf32> to vector<64xf32>
    %9 = vector.shape_cast %8 : vector<64xf32> to vector<64x1xf32>
    %10 = arith.addf %7, %9 : vector<64x1xf32>
    %11 = arith.mulf %2, %2 : vector<64x8xf32>
    %cst_7 = arith.constant dense<0.000000e+00> : vector<64xf32>
    %12 = vector.multi_reduction <add>, %11, %cst_7 [1] : vector<64x8xf32> to vector<64xf32>
    %13 = vector.shape_cast %12 : vector<64xf32> to vector<64x1xf32>
    %14 = arith.mulf %5, %5 : vector<64x8xf32>
    %cst_8 = arith.constant dense<0.000000e+00> : vector<64xf32>
    %15 = vector.multi_reduction <add>, %14, %cst_8 [1] : vector<64x8xf32> to vector<64xf32>
    %16 = vector.shape_cast %15 : vector<64xf32> to vector<64x1xf32>
    %17 = arith.addf %13, %16 : vector<64x1xf32>
    %cst_9 = arith.constant 6.250000e-02 : f32
    %18 = vector.broadcast %cst_9 : f32 to vector<64x1xf32>
    %19 = arith.mulf %10, %18 : vector<64x1xf32>
    %cst_10 = arith.constant 6.250000e-02 : f32
    %20 = vector.broadcast %cst_10 : f32 to vector<64x1xf32>
    %21 = arith.mulf %17, %20 : vector<64x1xf32>
    %22 = arith.mulf %19, %19 : vector<64x1xf32>
    %23 = arith.subf %21, %22 : vector<64x1xf32>
    %cst_11 = arith.constant 0.000000e+00 : f32
    %24 = vector.broadcast %cst_11 : f32 to vector<64x1xf32>
    %25 = arith.maximumf %23, %24 : vector<64x1xf32>
    %cst_12 = arith.constant 9.99999974E-6 : f32
    %26 = vector.broadcast %cst_12 : f32 to vector<64x1xf32>
    %27 = arith.addf %25, %26 : vector<64x1xf32>
    %28 = math.rsqrt %27 : vector<64x1xf32>
    %c0_13 = arith.constant 0 : index
    %c0_14 = arith.constant 0 : index
    %c0_15 = arith.constant 0 : index
    %29 = vector.load %arg2[%c0_13, %c0_14, %c0_15] : memref<2x8x8xf32, #tpu.memory_space<vmem>>, vector<1x8x8xf32>
    %30 = vector.shape_cast %29 : vector<1x8x8xf32> to vector<8x8xf32>
    %cst_16 = arith.constant dense<0.000000e+00> : vector<64x8xf32>
    %31 = tpu.matmul %2, %30, %cst_16 {dimension_numbers = #tpu.dot_dimension_numbers<[1], [0], [0], [1], [0, 0, 1, 1], [], []>} : vector<64x8xf32>, vector<8x8xf32>, vector<64x8xf32> -> vector<64x8xf32>
    %c1_17 = arith.constant 1 : index
    %c0_18 = arith.constant 0 : index
    %c0_19 = arith.constant 0 : index
    %32 = vector.load %arg2[%c1_17, %c0_18, %c0_19] : memref<2x8x8xf32, #tpu.memory_space<vmem>>, vector<1x8x8xf32>
    %33 = vector.shape_cast %32 : vector<1x8x8xf32> to vector<8x8xf32>
    %cst_20 = arith.constant dense<0.000000e+00> : vector<64x8xf32>
    %34 = tpu.matmul %5, %33, %cst_20 {dimension_numbers = #tpu.dot_dimension_numbers<[1], [0], [0], [1], [0, 0, 1, 1], [], []>} : vector<64x8xf32>, vector<8x8xf32>, vector<64x8xf32> -> vector<64x8xf32>
    %35 = arith.addf %31, %34 : vector<64x8xf32>
    %c0_21 = arith.constant 0 : index
    %c0_22 = arith.constant 0 : index
    %c0_23 = arith.constant 0 : index
    %36 = vector.load %arg3[%c0_21, %c0_22, %c0_23] : memref<2x1x8xf32, #tpu.memory_space<vmem>>, vector<1x1x8xf32>
    %37 = vector.shape_cast %36 : vector<1x1x8xf32> to vector<1x8xf32>
    %38 = vector.broadcast %19 : vector<64x1xf32> to vector<64x8xf32>
    %39 = vector.broadcast %37 : vector<1x8xf32> to vector<64x8xf32>
    %40 = arith.mulf %38, %39 : vector<64x8xf32>
    %41 = arith.subf %35, %40 : vector<64x8xf32>
    %42 = vector.broadcast %28 : vector<64x1xf32> to vector<64x8xf32>
    %43 = arith.mulf %41, %42 : vector<64x8xf32>
    %c1_24 = arith.constant 1 : index
    %c0_25 = arith.constant 0 : index
    %c0_26 = arith.constant 0 : index
    %44 = vector.load %arg3[%c1_24, %c0_25, %c0_26] : memref<2x1x8xf32, #tpu.memory_space<vmem>>, vector<1x1x8xf32>
    %45 = vector.shape_cast %44 : vector<1x1x8xf32> to vector<1x8xf32>
    %46 = vector.broadcast %45 : vector<1x8xf32> to vector<64x8xf32>
    %47 = arith.addf %43, %46 : vector<64x8xf32>
    %c0_27 = arith.constant 0 : index
    %c0_28 = arith.constant 0 : index
    %48 = vector.load %arg4[%c0_27, %c0_28] : memref<64x8xf32, #tpu.memory_space<vmem>>, vector<64x8xf32>
    tpu.vector_store %arg4[%c0_27, %c0_28], %47 {strides = array<i32>} : memref<64x8xf32, #tpu.memory_space<vmem>>, vector<64x8xf32>,
    return
  }
  func.func @transform_0(%arg0: i32) -> (i32, i32, i32, i32) {
    %c0_i32 = arith.constant 0 : i32
    %c0_i32_0 = arith.constant 0 : i32
    %c0_i32_1 = arith.constant 0 : i32
    %c0_i32_2 = arith.constant 0 : i32
    return %arg0, %c0_i32, %c0_i32_0, %c0_i32_1 : i32, i32, i32, i32
  }
  func.func @transform_1(%arg0: i32) -> (i32, i32, i32) {
    %c0_i32 = arith.constant 0 : i32
    %c0_i32_0 = arith.constant 0 : i32
    %c0_i32_1 = arith.constant 0 : i32
    %c0_i32_2 = arith.constant 0 : i32
    return %c0_i32, %c0_i32_0, %c0_i32_1 : i32, i32, i32
  }
  func.func @transform_2(%arg0: i32) -> (i32, i32, i32) {
    %c0_i32 = arith.constant 0 : i32
    %c0_i32_0 = arith.constant 0 : i32
    %c0_i32_1 = arith.constant 0 : i32
    %c0_i32_2 = arith.constant 0 : i32
    return %c0_i32, %c0_i32_0, %c0_i32_1 : i32, i32, i32
  }
  func.func @transform_3(%arg0: i32) -> (i32, i32) {
    %c0_i32 = arith.constant 0 : i32
    %c0_i32_0 = arith.constant 0 : i32
    return %arg0, %c0_i32 : i32, i32
  }
}

</mosaic_0001>

<bundles_post_ra>
// kernel: patch_merging.1
= control target key start
LH: loop header
LB: loop body
LE: loop exit
PB: predicated region body
PF: predicated region fallthrough
CT: control target
= control target key end

     0   :  { %s898_s12 = smov 0   ;;  %s1129_s0 = inlined_call_operand.vmem [shape: f32[16,2,8,8], index: 0, kind: input, shape index: {}]   ;;  %s1130_s1 = inlined_call_operand.vmem [shape: f32[2,8,8], index: 1, kind: input, shape index: {}]   ;;  %s1131_s2 = inlined_call_operand.vmem [shape: f32[2,1,8], index: 2, kind: input, shape index: {}]   ;;  %s1132_s3 = inlined_call_operand.vmem [shape: f32[128,8], index: 3, kind: output, shape index: {}]  }
   0x1 LB: > { %s751_s13 = sadd.s32 4294967295, %s876_s12   ;;  %p755_p0 = scmp.ge.s32.totalorder %s876_s12, 1  ;;  %s876_s12 = sphi %s898_s12, %s13_s12  }
   0x2   : > { %p139_p1 = scmp.lt.s32.totalorder %s876_s12, 3 }
   0x4   : > { %p140_p2 = pnand %p755_p0, %p139_p1 }
   0x5   : > { %v769_v0 = vld [vmem:[%s1130_s1 + $0x8] sm:$0xff] (!%p140_p2)  ;;  %v379_v1 = vld [vmem:[%s1130_s1] sm:$0xff] (!%p140_p2)  ;;  %s756_s18 = sshll.u32 (!%p140_p2), %s751_s13, 3  ;;  %vm194_vm0 = vcmask (!%p140_p2), 64512  }
   0x6   : > { %143 = sbr.rel (%p140_p2) target bundleno = 252 (0xfc), region = 32  ;;  %810 = vmatprep.subr.mxu1 (!%p140_p2), %v769_v0  ;;  %824 = vmatprep.subr.mxu0 (!%p140_p2), %v379_v1  ;;  %p165_p3 = scmp.lt.s32.totalorder (!%p140_p2), %s756_s18, 15 }
   0x7   : > { %811 = vmatpush3.msra.mxu1 (!%p140_p2), %v769_v0  ;;  %825 = vmatpush3.msra.mxu0 (!%p140_p2), %v379_v1 }
   0xd   : > { %s1134_s18 = smov (!%p165_p3, %s756_s18), 15 }
   0xe   : > { %s791_s19 = sshll.u32 %s1134_s18, 4  ;;  %s760_s25 = sshll.u32 %s1134_s18, 3 }
   0xf   : > { %s918_s22 = scalar_lea.vmem %s1129_s0, %s791_s19  ;;  %s1092_s30 = scalar_lea.vmem %s1132_s3, %s760_s25 }
  0x10   : > { %v921_v2 = vld [vmem:[%s918_s22 + $0x8] sm:$0xff]  ;;  %v177_v3 = vld [vmem:[%s918_s22] sm:$0xff]  ;;  %v925_v4 = vld [vmem:[%s918_s22 + $0x18] sm:$0xff] }
  0x11   : > { %812 = vmatprep.mubr.msk.f32.mxu1 %vm194_vm0, %v921_v2  ;;  %826 = vmatprep.mubr.msk.f32.mxu0 %vm194_vm0, %v177_v3  ;;  %v931_v5 = vld [vmem:[%s918_s22 + $0x20] sm:$0xff]  ;;  %v178_v6 = vld [vmem:[%s918_s22 + $0x10] sm:$0xff]  ;;  %v195_v7 = vsel %vm194_vm0, %v177_v3, 0.0  ;;  %v936_v8 = vld [vmem:[%s918_s22 + $0x28] sm:$0xff]  ;;  %v222_v26 = vsel %vm194_vm0, %v925_v4, 0.0  ;;  %v219_v27 = vsel %vm194_vm0, %v921_v2, 0.0  ;;  %v251_v35 = vmul.f32 %v177_v3, %v177_v3 }
  0x12   : > { %813 = vmatmul.mubr.msk.f32.vlgmr.msra.gmra.mrb[0].mxu1 %vm194_vm0, %v925_v4  ;;  %v201_v9 = vsel %vm194_vm0, %v931_v5, 0.0  ;;  %827 = vmatmul.mubr.msk.f32.vlgmr.msra.gmra.mrb[0].mxu0 %vm194_vm0, %v178_v6  ;;  %v180_v10 = vld [vmem:[%s918_s22 + $0x30] sm:$0xff]  ;;  %v945_v11 = vld [vmem:[%s918_s22 + $0x38] sm:$0xff]  ;;  %v198_v13 = vsel %vm194_vm0, %v178_v6, 0.0  ;;  %v954_v14 = vld [vmem:[%s918_s22 + $0x48] sm:$0xff]  ;;  %v225_v29 = vsel %vm194_vm0, %v936_v8, 0.0  ;;  %v252_v34 = vmul.f32 %v178_v6, %v178_v6 }
  0x13   : > { %202 = vadd.xlane.f32.xlu1 %v201_v9  ;;  %196 = vadd.xlane.f32.xlu0 %v195_v7  ;;  %v204_v12 = vsel %vm194_vm0, %v180_v10, 0.0  ;;  %v181_v15 = vld [vmem:[%s918_s22 + $0x40] sm:$0xff]  ;;  %v182_v16 = vld [vmem:[%s918_s22 + $0x50] sm:$0xff]  ;;  %v962_v17 = vld [vmem:[%s918_s22 + $0x58] sm:$0xff]  ;;  %v228_v28 = vsel %vm194_vm0, %v945_v11, 0.0  ;;  %v231_v31 = vsel %vm194_vm0, %v954_v14, 0.0  ;;  %v254_v38 = vmul.f32 %v180_v10, %v180_v10 }
  0x14   : > { %815 = vmatprep.mubr.msk.f32.mxu1 %vm194_vm0, %v936_v8  ;;  %829 = vmatprep.mubr.msk.f32.mxu0 %vm194_vm0, %v931_v5  ;;  %v210_v18 = vsel %vm194_vm0, %v182_v16, 0.0  ;;  %v207_v19 = vsel %vm194_vm0, %v181_v15, 0.0  ;;  %v970_v20 = vld [vmem:[%s918_s22 + $0x68] sm:$0xff]  ;;  %v183_v21 = vld [vmem:[%s918_s22 + $0x60] sm:$0xff]  ;;  %v184_v22 = vld [vmem:[%s918_s22 + $0x70] sm:$0xff]  ;;  %v234_v30 = vsel %vm194_vm0, %v962_v17, 0.0  ;;  %v253_v39 = vmul.f32 %v931_v5, %v931_v5 }
  0x15   : > { %v978_v23 = vld [vmem:[%s918_s22 + $0x78] sm:$0xff]  ;;  %v216_v24 = vsel %vm194_vm0, %v184_v22, 0.0  ;;  %v213_v25 = vsel %vm194_vm0, %v183_v21, 0.0  ;;  %v237_v33 = vsel %vm194_vm0, %v970_v20, 0.0  ;;  %v262_v36 = vsel %vm194_vm0, %v252_v34, 0.0 }
  0x16   : > { %816 = vmatmul.mubr.msk.f32.gmra.mrb[2].mxu1 %vm194_vm0, %v945_v11  ;;  %830 = vmatmul.mubr.msk.f32.gmra.mrb[2].mxu0 %vm194_vm0, %v180_v10  ;;  %v240_v32 = vsel %vm194_vm0, %v978_v23, 0.0  ;;  %v259_v37 = vsel %vm194_vm0, %v251_v35, 0.0  ;;  %v268_v40 = vsel %vm194_vm0, %v254_v38, 0.0  ;;  %v265_v41 = vsel %vm194_vm0, %v253_v39, 0.0 }
  0x17   : > { %205 = vadd.xlane.f32.xlu1 %v204_v12  ;;  %199 = vadd.xlane.f32.xlu0 %v198_v13  ;;  %v256_v42 = vmul.f32 %v182_v16, %v182_v16  ;;  %v255_v43 = vmul.f32 %v181_v15, %v181_v15  ;;  %v258_v46 = vmul.f32 %v184_v22, %v184_v22 }
  0x18   : > { %818 = vmatprep.mubr.msk.f32.mxu1 %vm194_vm0, %v954_v14  ;;  %832 = vmatprep.mubr.msk.f32.mxu0 %vm194_vm0, %v181_v15  ;;  %v257_v47 = vmul.f32 %v183_v21, %v183_v21  ;;  %v284_v50 = vmul.f32 %v925_v4, %v925_v4  ;;  %v283_v51 = vmul.f32 %v921_v2, %v921_v2 }
  0x19   : > { %v274_v44 = vsel %vm194_vm0, %v256_v42, 0.0  ;;  %v271_v45 = vsel %vm194_vm0, %v255_v43, 0.0  ;;  %v280_v48 = vsel %vm194_vm0, %v258_v46, 0.0  ;;  %v286_v54 = vmul.f32 %v945_v11, %v945_v11 }
  0x1a   : > { %819 = vmatmul.mubr.msk.f32.gmra.mrb[4].mxu1 %vm194_vm0, %v962_v17  ;;  %833 = vmatmul.mubr.msk.f32.gmra.mrb[4].mxu0 %vm194_vm0, %v182_v16  ;;  %v277_v49 = vsel %vm194_vm0, %v257_v47, 0.0  ;;  %v294_v52 = vsel %vm194_vm0, %v284_v50, 0.0  ;;  %v291_v53 = vsel %vm194_vm0, %v283_v51, 0.0  ;;  %v285_v55 = vmul.f32 %v936_v8, %v936_v8 }
  0x1b   : > { %211 = vadd.xlane.f32.xlu1 %v210_v18  ;;  %208 = vadd.xlane.f32.xlu0 %v207_v19  ;;  %v300_v56 = vsel %vm194_vm0, %v286_v54, 0.0  ;;  %v288_v58 = vmul.f32 %v962_v17, %v962_v17  ;;  %v287_v59 = vmul.f32 %v954_v14, %v954_v14  ;;  %v290_v62 = vmul.f32 %v978_v23, %v978_v23 }
  0x1c   : > { %821 = vmatprep.mubr.msk.f32.mxu1 %vm194_vm0, %v970_v20  ;;  %835 = vmatprep.mubr.msk.f32.mxu0 %vm194_vm0, %v183_v21  ;;  %v297_v57 = vsel %vm194_vm0, %v285_v55, 0.0  ;;  %v289_v63 = vmul.f32 %v970_v20, %v970_v20 }
  0x1d   : > { %v306_v60 = vsel %vm194_vm0, %v288_v58, 0.0  ;;  %v303_v61 = vsel %vm194_vm0, %v287_v59, 0.0  ;;  %v312_v0 = vsel %vm194_vm0, %v290_v62, 0.0 }
  0x1e   : > { %822 = vmatmul.mubr.msk.f32.gmra.mrb[6].mxu1 %vm194_vm0, %v978_v23  ;;  %836 = vmatmul.mubr.msk.f32.gmra.mrb[6].mxu0 %vm194_vm0, %v184_v22  ;;  %v309_v1 = vsel %vm194_vm0, %v289_v63, 0.0 }
  0x1f   : > { %217 = vadd.xlane.f32.xlu1 %v216_v24  ;;  %214 = vadd.xlane.f32.xlu0 %v213_v25 }
  0x23   : > { %223 = vadd.xlane.f32.xlu1 %v222_v26  ;;  %220 = vadd.xlane.f32.xlu0 %v219_v27 }
  0x27   : > { %229 = vadd.xlane.f32.xlu1 %v228_v28  ;;  %226 = vadd.xlane.f32.xlu0 %v225_v29 }
  0x2b   : > { %235 = vadd.xlane.f32.xlu1 %v234_v30  ;;  %232 = vadd.xlane.f32.xlu0 %v231_v31 }
  0x2f   : > { %241 = vadd.xlane.f32.xlu1 %v240_v32  ;;  %238 = vadd.xlane.f32.xlu0 %v237_v33 }
  0x33   : > { %263 = vadd.xlane.f32.xlu1 %v262_v36  ;;  %260 = vadd.xlane.f32.xlu0 %v259_v37 }
  0x37   : > { %269 = vadd.xlane.f32.xlu1 %v268_v40  ;;  %266 = vadd.xlane.f32.xlu0 %v265_v41 }
  0x3b   : > { %275 = vadd.xlane.f32.xlu1 %v274_v44  ;;  %272 = vadd.xlane.f32.xlu0 %v271_v45 }
  0x3f   : > { %281 = vadd.xlane.f32.xlu1 %v280_v48  ;;  %278 = vadd.xlane.f32.xlu0 %v277_v49 }
  0x43   : > { %295 = vadd.xlane.f32.xlu1 %v294_v52  ;;  %292 = vadd.xlane.f32.xlu0 %v291_v53 }
  0x47   : > { %301 = vadd.xlane.f32.xlu1 %v300_v56  ;;  %298 = vadd.xlane.f32.xlu0 %v297_v57 }
  0x4b   : > { %307 = vadd.xlane.f32.xlu1 %v306_v60  ;;  %304 = vadd.xlane.f32.xlu0 %v303_v61 }
  0x4f   : > { %313 = vadd.xlane.f32.xlu1 %v312_v0  ;;  %310 = vadd.xlane.f32.xlu0 %v309_v1 }
  0xa0   : > { %v203_v2 = vpop.xlane.xlu1 %202  ;;  %v197_v3 = vpop.xlane.xlu0 %196 }
  0xa4   : > { %v206_v4 = vpop.xlane.xlu1 %205  ;;  %v200_v5 = vpop.xlane.xlu0 %199 }
  0xa8   : > { %v212_v6 = vpop.xlane.xlu1 %211  ;;  %v209_v7 = vpop.xlane.xlu0 %208 }
  0xac   : > { %v218_v8 = vpop.xlane.xlu1 %217  ;;  %v215_v9 = vpop.xlane.xlu0 %214 }
  0xb0   : > { %v224_v10 = vpop.xlane.xlu1 %223  ;;  %v221_v11 = vpop.xlane.xlu0 %220 }
  0xb1   : > { %v244_v24 = vadd.f32 %v224_v10, %v200_v5  ;;  %v243_v25 = vadd.f32 %v221_v11, %v197_v3 }
  0xb3   : > { %v1038_v29 = vmul.f32 0.0625, %v244_v24  ;;  %v1040_v31 = vmul.f32 0.0625, %v243_v25 }
  0xb4   : > { %v230_v12 = vpop.xlane.xlu1 %229  ;;  %v227_v13 = vpop.xlane.xlu0 %226 }
  0xb5   : > { %v246_v26 = vadd.f32 %v230_v12, %v206_v4  ;;  %v245_v30 = vadd.f32 %v227_v13, %v203_v2  ;;  %v340_v37 = vmul.f32 %v1038_v29, %v1038_v29  ;;  %v339_v40 = vmul.f32 %v1040_v31, %v1040_v31 }
  0xb7   : > { %v1042_v32 = vmul.f32 0.0625, %v246_v26  ;;  %v1046_v38 = vmul.f32 0.0625, %v245_v30 }
  0xb8   : > { %v236_v14 = vpop.xlane.xlu1 %235  ;;  %v233_v15 = vpop.xlane.xlu0 %232 }
  0xb9   : > { %v248_v39 = vadd.f32 %v236_v14, %v212_v6  ;;  %v247_v41 = vadd.f32 %v233_v15, %v209_v7  ;;  %v342_v44 = vmul.f32 %v1042_v32, %v1042_v32  ;;  %v341_v51 = vmul.f32 %v1046_v38, %v1046_v38 }
  0xbb   : > { %v1054_v52 = vmul.f32 0.0625, %v248_v39  ;;  %v1056_v55 = vmul.f32 0.0625, %v247_v41 }
  0xbc   : > { %v242_v16 = vpop.xlane.xlu1 %241  ;;  %v239_v17 = vpop.xlane.xlu0 %238 }
  0xbd   : > { %v250_v53 = vadd.f32 %v242_v16, %v218_v8  ;;  %v249_v54 = vadd.f32 %v239_v17, %v215_v9  ;;  %v344_v4 = vmul.f32 %v1054_v52, %v1054_v52  ;;  %v343_v5 = vmul.f32 %v1056_v55, %v1056_v55 }
  0xbf   : > { %v1058_v0 = vmul.f32 0.0625, %v250_v53  ;;  %v1060_v1 = vmul.f32 0.0625, %v249_v54 }
  0xc0   : > { %v264_v18 = vpop.xlane.xlu1 %263  ;;  %v261_v19 = vpop.xlane.xlu0 %260 }
  0xc1   : > { %v346_v16 = vmul.f32 %v1058_v0, %v1058_v0  ;;  %v345_v17 = vmul.f32 %v1060_v1, %v1060_v1 }
  0xc4   : > { %v270_v20 = vpop.xlane.xlu1 %269  ;;  %v267_v21 = vpop.xlane.xlu0 %266 }
  0xc8   : > { %v276_v22 = vpop.xlane.xlu1 %275  ;;  %v273_v23 = vpop.xlane.xlu0 %272 }
  0xcc   : > { %v282_v27 = vpop.xlane.xlu1 %281  ;;  %v279_v28 = vpop.xlane.xlu0 %278 }
  0xd0   : > { %v296_v33 = vpop.xlane.xlu1 %295  ;;  %v293_v34 = vpop.xlane.xlu0 %292 }
  0xd1   : > { %v316_v35 = vadd.f32 %v296_v33, %v264_v18  ;;  %v315_v36 = vadd.f32 %v293_v34, %v261_v19 }
  0xd3   : > { %v332_v42 = vmul.f32 0.0625, %v316_v35  ;;  %v331_v43 = vmul.f32 0.0625, %v315_v36 }
  0xd4   : > { %v302_v45 = vpop.xlane.xlu1 %301  ;;  %v299_v46 = vpop.xlane.xlu0 %298 }
  0xd5   : > { %v348_v47 = vsub.f32 %v332_v42, %v340_v37  ;;  %v347_v48 = vsub.f32 %v331_v43, %v339_v40  ;;  %v318_v49 = vadd.f32 %v302_v45, %v270_v20  ;;  %v317_v50 = vadd.f32 %v299_v46, %v267_v21 }
  0xd7   : > { %v356_v56 = vmax.f32 %v348_v47, 0.0  ;;  %v334_v57 = vmul.f32 0.0625, %v318_v49  ;;  %v333_v58 = vmul.f32 0.0625, %v317_v50  ;;  %v355_v59 = vmax.f32 %v347_v48, 0.0  ;;  %v1083_v49 = vld [vmem:[%s1131_s2 + $0x1] ss:$0 sm:$0xff] }
  0xd8   : > { %v308_v60 = vpop.xlane.xlu1 %307  ;;  %v305_v61 = vpop.xlane.xlu0 %304 }
  0xd9   : > { %v350_v62 = vsub.f32 %v334_v57, %v342_v44  ;;  %v349_v63 = vsub.f32 %v333_v58, %v341_v51  ;;  %v320_v2 = vadd.f32 %v308_v60, %v276_v22  ;;  %v319_v3 = vadd.f32 %v305_v61, %v273_v23 }
  0xda   : > { %v364_v6 = vadd.f32 1e-05, %v356_v56  ;;  %v363_v8 = vadd.f32 1e-05, %v355_v59 }
  0xdb   : > { %v358_v7 = vmax.f32 %v350_v62, 0.0  ;;  %v357_v9 = vmax.f32 %v349_v63, 0.0  ;;  %v336_v10 = vmul.f32 0.0625, %v320_v2  ;;  %v335_v11 = vmul.f32 0.0625, %v319_v3 }
  0xdc   : > { %v314_v12 = vpop.xlane.xlu1 %313  ;;  %v311_v13 = vpop.xlane.xlu0 %310  ;;  %854 = vrsqrt.f32 %v364_v6 }
  0xdd   : > { %v322_v14 = vadd.f32 %v314_v12, %v282_v27  ;;  %v321_v15 = vadd.f32 %v311_v13, %v279_v28  ;;  %v352_v18 = vsub.f32 %v336_v10, %v344_v4  ;;  %v351_v19 = vsub.f32 %v335_v11, %v343_v5  ;;  %v1073_v27 = vld [vmem:[%s1131_s2] ss:$0 sm:$0xff] }
  0xde   : > { %v366_v20 = vadd.f32 1e-05, %v358_v7  ;;  %856 = vrsqrt.f32 %v363_v8  ;;  %v365_v23 = vadd.f32 1e-05, %v357_v9  ;;  %v648_v39 = vmul.f32 %v1073_v27, %v1038_v29 }
  0xdf   : > { %v338_v21 = vmul.f32 0.0625, %v322_v14  ;;  %v337_v22 = vmul.f32 0.0625, %v321_v15  ;;  %v360_v24 = vmax.f32 %v352_v18, 0.0  ;;  %v359_v25 = vmax.f32 %v351_v19, 0.0 }
  0xe0   : > { %858 = vrsqrt.f32 %v366_v20  ;;  %v647_v43 = vmul.f32 %v1073_v27, %v1040_v31  ;;  %v650_v31 = vmul.f32 %v1073_v27, %v1042_v32  ;;  %v649_v59 = vmul.f32 %v1073_v27, %v1046_v38 }
  0xe1   : > { %v354_v26 = vsub.f32 %v338_v21, %v346_v16  ;;  %v353_v30 = vsub.f32 %v337_v22, %v345_v17  ;;  %v368_v28 = vadd.f32 1e-05, %v360_v24  ;;  %860 = vrsqrt.f32 %v365_v23 }
  0xe2   : > { %v367_v34 = vadd.f32 1e-05, %v359_v25  ;;  %v652_v6 = vmul.f32 %v1073_v27, %v1054_v52  ;;  %v651_v11 = vmul.f32 %v1073_v27, %v1056_v55  ;;  %v654_v21 = vmul.f32 %v1073_v27, %v1058_v0 }
  0xe3   : > { %v362_v33 = vmax.f32 %v354_v26, 0.0  ;;  %v361_v35 = vmax.f32 %v353_v30, 0.0  ;;  %862 = vrsqrt.f32 %v368_v28  ;;  %v653_v25 = vmul.f32 %v1073_v27, %v1060_v1 }
  0xe4   : > { %864 = vrsqrt.f32 %v367_v34 }
  0xe5   : > { %v814_v36 = vpop.f32.mrb[0].mxu1  ;;  %v828_v37 = vpop.f32.mrb[0].mxu0  ;;  %v370_v44 = vadd.f32 1e-05, %v362_v33  ;;  %v369_v46 = vadd.f32 1e-05, %v361_v35 }
  0xe6   : > { %v607_v40 = vadd.f32 %v828_v37, %v814_v36  ;;  %v472_v41 = vpop.f32.mrb[1].mxu1  ;;  %v601_v42 = vpop.f32.mrb[1].mxu0 }
  0xe7   : > { %v602_v45 = vadd.f32 %v601_v42, %v472_v41  ;;  %v855_v48 = vpop.eup %854  ;;  %866 = vrsqrt.f32 %v370_v44 }
  0xe8   : > { %v656_v47 = vsub.f32 %v607_v40, %v648_v39  ;;  %v857_v53 = vpop.eup %856  ;;  %868 = vrsqrt.f32 %v369_v46 }
  0xe9   : > { %v655_v29 = vsub.f32 %v602_v45, %v647_v43  ;;  %v817_v50 = vpop.f32.mrb[2].mxu1  ;;  %v831_v51 = vpop.f32.mrb[2].mxu0 }
  0xea   : > { %v664_v54 = vmul.f32 %v855_v48, %v656_v47  ;;  %v617_v56 = vadd.f32 %v831_v51, %v817_v50  ;;  %v482_v57 = vpop.f32.mrb[3].mxu1  ;;  %v611_v58 = vpop.f32.mrb[3].mxu0 }
  0xeb   : > { %v663_v60 = vmul.f32 %v857_v53, %v655_v29  ;;  %v612_v61 = vadd.f32 %v611_v58, %v482_v57  ;;  %v859_v63 = vpop.eup %858 }
  0xec   : > { %v680_v32 = vadd.f32 %v1083_v49, %v664_v54  ;;  %v658_v62 = vsub.f32 %v617_v56, %v650_v31  ;;  %v861_v5 = vpop.eup %860 }
  0xed   : > { %v679_v2 = vadd.f32 %v1083_v49, %v663_v60  ;;  %v657_v3 = vsub.f32 %v612_v61, %v649_v59  ;;  %v820_v4 = vpop.f32.mrb[4].mxu1  ;;  %v834_v38 = vpop.f32.mrb[4].mxu0 }
  0xee   : > { %688 = vst.msk [vmem:[%s1092_s30 + $0x8] sm:$0xff] %vm194_vm0, %v680_v32  ;;  %v666_v7 = vmul.f32 %v859_v63, %v658_v62  ;;  %v627_v8 = vadd.f32 %v834_v38, %v820_v4  ;;  %v492_v9 = vpop.f32.mrb[5].mxu1  ;;  %v621_v10 = vpop.f32.mrb[5].mxu0 }
  0xef   : > { %687 = vst.msk [vmem:[%s1092_s30] sm:$0xff] %vm194_vm0, %v679_v2  ;;  %v665_v12 = vmul.f32 %v861_v5, %v657_v3  ;;  %v622_v13 = vadd.f32 %v621_v10, %v492_v9  ;;  %v863_v16 = vpop.eup %862 }
  0xf0   : > { %v682_v14 = vadd.f32 %v1083_v49, %v666_v7  ;;  %v660_v15 = vsub.f32 %v627_v8, %v652_v6  ;;  %v865_v20 = vpop.eup %864 }
  0xf1   : > { %v681_v52 = vadd.f32 %v1083_v49, %v665_v12  ;;  %v659_v17 = vsub.f32 %v622_v13, %v651_v11  ;;  %v823_v18 = vpop.f32.mrb[6].mxu1  ;;  %v837_v19 = vpop.f32.mrb[6].mxu0 }
  0xf2   : > { %690 = vst.msk [vmem:[%s1092_s30 + $0x18] sm:$0xff] %vm194_vm0, %v682_v14  ;;  %v668_v55 = vmul.f32 %v863_v16, %v660_v15  ;;  %v637_v22 = vadd.f32 %v837_v19, %v823_v18  ;;  %v502_v23 = vpop.f32.mrb[7].mxu1  ;;  %v631_v24 = vpop.f32.mrb[7].mxu0 }
  0xf3   : > { %689 = vst.msk [vmem:[%s1092_s30 + $0x10] sm:$0xff] %vm194_vm0, %v681_v52  ;;  %v667_v26 = vmul.f32 %v865_v20, %v659_v17  ;;  %v632_v30 = vadd.f32 %v631_v24, %v502_v23  ;;  %v867_v33 = vpop.eup %866 }
  0xf4   : > { %v684_v28 = vadd.f32 %v1083_v49, %v668_v55  ;;  %v662_v0 = vsub.f32 %v637_v22, %v654_v21  ;;  %v869_v36 = vpop.eup %868 }
  0xf5   : > { %v683_v34 = vadd.f32 %v1083_v49, %v667_v26  ;;  %v661_v35 = vsub.f32 %v632_v30, %v653_v25 }
  0xf6   : > { %692 = vst.msk [vmem:[%s1092_s30 + $0x28] sm:$0xff] %vm194_vm0, %v684_v28  ;;  %v670_v37 = vmul.f32 %v867_v33, %v662_v0 }
  0xf7   : > { %691 = vst.msk [vmem:[%s1092_s30 + $0x20] sm:$0xff] %vm194_vm0, %v683_v34  ;;  %v669_v1 = vmul.f32 %v869_v36, %v661_v35 }
  0xf8   : > { %v686_v27 = vadd.f32 %v1083_v49, %v670_v37 }
  0xf9   : > { %v685_v39 = vadd.f32 %v1083_v49, %v669_v1 }
  0xfa   : > { %694 = vst.msk [vmem:[%s1092_s30 + $0x38] sm:$0xff] %vm194_vm0, %v686_v27 }
  0xfb   : > { %693 = vst.msk [vmem:[%s1092_s30 + $0x30] sm:$0xff] %vm194_vm0, %v685_v39 }
  0xfc PF: > { %s13_s12 = sadd.s32 1, %s876_s12  }
  0xfd   : > { %p10_p4 = scmp.ge.s32.totalorder %s13_s12, 4  }
  0xff   :  { %12 = sbr.rel (!%p10_p4) target bundleno = 1 (0x1), region = 65 }

</bundles_post_ra>
